<compile_context>
chip_gen: v7x
topology: tpu7x:2x2x1
jax: 0.10.0
libtpu: 0.0.40
codegen_flags: <defaults>
</compile_context>

<pallas_src>
import jax
import jax.numpy as jnp
from jax.experimental import pallas as pl
from jax.experimental.pallas import tpu as pltpu

SUBLANE = 8   # vreg sublane width (second-last dim granularity)


def _cdiv(a, b):
    return (a + b - 1) // b


def _round_up(n, m):
    return _cdiv(n, m) * m


# ----------------------------------------------------------------------------- kernel

def mlp_kernel(x_ref,
               w1_ref, b1_ref,
               w2_ref, b2_ref,
               w3_ref, b3_ref,
               w4_ref, b4_ref,
               o_ref):
    x = x_ref[...]

    # Layer 1: Linear + ReLU (MXU matmul with f32 accumulation; bias add + ReLU on the VPU)
    h = jnp.dot(x, w1_ref[...], preferred_element_type=jnp.float32) + b1_ref[...]
    h = jnp.maximum(h, 0.0)

    # Layer 2: Linear + ReLU
    h = jnp.dot(h, w2_ref[...], preferred_element_type=jnp.float32) + b2_ref[...]
    h = jnp.maximum(h, 0.0)

    # Layer 3: Linear + ReLU
    h = jnp.dot(h, w3_ref[...], preferred_element_type=jnp.float32) + b3_ref[...]
    h = jnp.maximum(h, 0.0)

    # Layer 4: Linear (no activation)
    y = jnp.dot(h, w4_ref[...], preferred_element_type=jnp.float32) + b4_ref[...]

    o_ref[...] = y.astype(o_ref.dtype)


# ----------------------------------------------------------------------------- tiling

def _choose_batch_tiling(batch, max_block_batch, min_parallel_tiles, min_parallel_tile_rows):
    """Pick (tile_rows, grid_steps, padded_batch) minimizing batch padding.

    * batch <= min_parallel_tile_rows: one full-array tile, zero padding (full-dim block is
      exempt from the sublane-divisibility rule).
    * otherwise: just enough grid steps to respect max_block_batch, bumped to
      min_parallel_tiles when the batch is large enough so each v7x TensorCore gets >= 2
      pipelined steps; tile rows rounded up to a multiple of 8 only.
    """
    if batch <= max(SUBLANE, min_parallel_tile_rows):
        return batch, 1, batch
    rounded = _round_up(batch, SUBLANE)
    grid_m = _cdiv(rounded, max_block_batch)
    if rounded >= min_parallel_tiles * min_parallel_tile_rows:
        grid_m = max(grid_m, min_parallel_tiles)
    tb = _round_up(_cdiv(rounded, grid_m), SUBLANE)
    padded_batch = tb * grid_m
    return tb, grid_m, padded_batch


# ----------------------------------------------------------------------------- wrapper

def regression_model_forward(x, params, *, max_block_batch=1024,
                             min_parallel_tiles=4, min_parallel_tile_rows=128):
    """x: (batch, input_dim) f32.  params: (w1,b1,w2,b2,w3,b3,w4,b4) at logical shapes."""
    w1, b1, w2, b2, w3, b3, w4, b4 = params
    batch, in_dim = x.shape
    hid = w1.shape[1]
    out_dim = w4.shape[1]

    tb, grid_m, padded_batch = _choose_batch_tiling(
        batch, max_block_batch, min_parallel_tiles, min_parallel_tile_rows)

    # Pad the batch axis only when actually required (avoids a full extra HBM copy of x).
    x_in = x if padded_batch == batch else jnp.pad(x, ((0, padded_batch - batch), (0, 0)))

    # Weights/biases: constant index_map -> same block every grid step -> fetched from HBM
    # exactly once and kept VMEM-resident; Buffered(1) avoids pointless double-buffering.
    def resident(arr):
        return pl.BlockSpec(arr.shape, lambda i: (0, 0), pipeline_mode=pl.Buffered(1))

    # VMEM budget: double-buffered x/out tiles + single-buffered weights/biases
    # + three (tb, hid) f32 layer intermediates.  Clamp to [32 MiB, 64 MiB] (v7x-safe).
    elt = 4
    param_elems = (in_dim * hid + 2 * hid * hid + hid * out_dim) + (3 * hid + out_dim)
    vmem_est = elt * (2 * tb * (in_dim + out_dim) + param_elems + 3 * tb * hid)
    vmem_limit = int(min(64 * 1024 * 1024, max(32 * 1024 * 1024, 2 * vmem_est)))

    # Advisory cost estimate for the XLA scheduler.
    flops = 2 * padded_batch * (in_dim * hid + 2 * hid * hid + hid * out_dim)
    bytes_accessed = elt * (padded_batch * (in_dim + out_dim) + param_elems)

    out = pl.pallas_call(
        mlp_kernel,
        out_shape=jax.ShapeDtypeStruct((padded_batch, out_dim), x.dtype),
        grid=(grid_m,),
        in_specs=[
            pl.BlockSpec((tb, in_dim), lambda i: (i, 0)),   # batch-tiled, pipelined
            resident(w1), resident(b1),
            resident(w2), resident(b2),
            resident(w3), resident(b3),
            resident(w4), resident(b4),
        ],
        out_specs=pl.BlockSpec((tb, out_dim), lambda i: (i, 0)),
        compiler_params=pltpu.CompilerParams(
            dimension_semantics=("parallel",),   # shard batch grid across TCs on v7x
            vmem_limit_bytes=vmem_limit,
        ),
        cost_estimate=pl.CostEstimate(
            flops=flops, transcendentals=0, bytes_accessed=bytes_accessed),
    )(x_in, w1, b1, w2, b2, w3, b3, w4, b4)

    return out if padded_batch == batch else out[:batch]


# ----------------------------------------------------------------------------- params & reference

def init_params(key, input_dim, hidden_dim, output_dim):
    """Deterministic synthetic parameters; weights stored as (in, out), biases as (1, out)."""
    ks = jax.random.split(key, 8)

    def dense(kw, kb, fan_in, fan_out):
        scale = 1.0 / jnp.sqrt(jnp.float32(fan_in))
        w = jax.random.uniform(kw, (fan_in, fan_out), jnp.float32, -scale, scale)
        b = jax.random.uniform(kb, (1, fan_out), jnp.float32, -scale, scale)
        return w, b

    w1, b1 = dense(ks[0], ks[1], input_dim, hidden_dim)
    w2, b2 = dense(ks[2], ks[3], hidden_dim, hidden_dim)
    w3, b3 = dense(ks[4], ks[5], hidden_dim, hidden_dim)
    w4, b4 = dense(ks[6], ks[7], hidden_dim, output_dim)
    return (w1, b1, w2, b2, w3, b3, w4, b4)


def reference_forward(x, params):
    """Pure-JAX reference of the PyTorch module's forward pass."""
    w1, b1, w2, b2, w3, b3, w4, b4 = params
    h = jnp.maximum(x @ w1 + b1, 0.0)
    h = jnp.maximum(h @ w2 + b2, 0.0)
    h = jnp.maximum(h @ w3 + b3, 0.0)
    return h @ w4 + b4


# ----------------------------------------------------------------------------- test

if __name__ == "__main__":
    input_dim, hidden_dim, output_dim = 16, 32, 4

    key = jax.random.PRNGKey(0)
    kx, kp, kx2 = jax.random.split(key, 3)
    params = init_params(kp, input_dim, hidden_dim, output_dim)

    # Small-shape check: single full-array tile, zero batch padding.
    batch = 8
    x = jax.random.normal(kx, (batch, input_dim), jnp.float32)
    out = jax.block_until_ready(regression_model_forward(x, params))
    ref = reference_forward(x, params)
    assert out.shape == (batch, output_dim), out.shape
    assert jnp.allclose(out, ref, atol=1e-5, rtol=1e-5), "mismatch vs JAX reference (small)"

    # Multi-step grid check: batch=600 -> grid=(4,), tb=152, padded batch 608 (8 wasted rows).
    batch2 = 600
    x2 = jax.random.normal(kx2, (batch2, input_dim), jnp.float32)
    out2 = jax.block_until_ready(regression_model_forward(x2, params))
    ref2 = reference_forward(x2, params)
    assert out2.shape == (batch2, output_dim), out2.shape
    assert jnp.allclose(out2, ref2, atol=1e-5, rtol=1e-5), "mismatch vs JAX reference (tiled)"

    print("KERNEL_OK")
</pallas_src>

<mosaic_0001>
module attributes {stable_mosaic.version = 11 : i64} {
  func.func @mlp_kernel(%arg0: i32, %arg1: memref<8x16xf32, #tpu.memory_space<vmem>>, %arg2: memref<16x32xf32, #tpu.memory_space<vmem>>, %arg3: memref<1x32xf32, #tpu.memory_space<vmem>>, %arg4: memref<32x32xf32, #tpu.memory_space<vmem>>, %arg5: memref<1x32xf32, #tpu.memory_space<vmem>>, %arg6: memref<32x32xf32, #tpu.memory_space<vmem>>, %arg7: memref<1x32xf32, #tpu.memory_space<vmem>>, %arg8: memref<32x4xf32, #tpu.memory_space<vmem>>, %arg9: memref<1x4xf32, #tpu.memory_space<vmem>>, %arg10: memref<8x4xf32, #tpu.memory_space<vmem>>) attributes {dimension_semantics = [#tpu.dimension_semantics<parallel>], iteration_bounds = array<i64: 1>, scalar_prefetch = 0 : i64, scratch_operands = 0 : i64, tpu.core_type = #tpu.core_type<tc>, window_params = [{transform_indices = @transform_0, window_bounds = array<i64: 8, 16>}, {pipeline_mode = #tpu.pipeline_mode<synchronous>, transform_indices = @transform_1, window_bounds = array<i64: 16, 32>}, {pipeline_mode = #tpu.pipeline_mode<synchronous>, transform_indices = @transform_2, window_bounds = array<i64: 1, 32>}, {pipeline_mode = #tpu.pipeline_mode<synchronous>, transform_indices = @transform_3, window_bounds = array<i64: 32, 32>}, {pipeline_mode = #tpu.pipeline_mode<synchronous>, transform_indices = @transform_4, window_bounds = array<i64: 1, 32>}, {pipeline_mode = #tpu.pipeline_mode<synchronous>, transform_indices = @transform_5, window_bounds = array<i64: 32, 32>}, {pipeline_mode = #tpu.pipeline_mode<synchronous>, transform_indices = @transform_6, window_bounds = array<i64: 1, 32>}, {pipeline_mode = #tpu.pipeline_mode<synchronous>, transform_indices = @transform_7, window_bounds = array<i64: 32, 4>}, {pipeline_mode = #tpu.pipeline_mode<synchronous>, transform_indices = @transform_8, window_bounds = array<i64: 1, 4>}, {transform_indices = @transform_9, window_bounds = array<i64: 8, 4>}]} {
    %c0 = arith.constant 0 : index
    %c0_0 = arith.constant 0 : index
    %0 = vector.load %arg1[%c0, %c0_0] : memref<8x16xf32, #tpu.memory_space<vmem>>, vector<8x16xf32>
    %c0_1 = arith.constant 0 : index
    %c0_2 = arith.constant 0 : index
    %1 = vector.load %arg2[%c0_1, %c0_2] : memref<16x32xf32, #tpu.memory_space<vmem>>, vector<16x32xf32>
    %cst = arith.constant dense<0.000000e+00> : vector<8x32xf32>
    %2 = tpu.matmul %0, %1, %cst {dimension_numbers = #tpu.dot_dimension_numbers<[1], [0], [0], [1], [0, 0, 1, 1], [], []>} : vector<8x16xf32>, vector<16x32xf32>, vector<8x32xf32> -> vector<8x32xf32>
    %c0_3 = arith.constant 0 : index
    %c0_4 = arith.constant 0 : index
    %3 = vector.load %arg3[%c0_3, %c0_4] : memref<1x32xf32, #tpu.memory_space<vmem>>, vector<1x32xf32>
    %4 = vector.broadcast %3 : vector<1x32xf32> to vector<8x32xf32>
    %5 = arith.addf %2, %4 : vector<8x32xf32>
    %cst_5 = arith.constant 0.000000e+00 : f32
    %6 = vector.broadcast %cst_5 : f32 to vector<8x32xf32>
    %7 = arith.maximumf %5, %6 : vector<8x32xf32>
    %c0_6 = arith.constant 0 : index
    %c0_7 = arith.constant 0 : index
    %8 = vector.load %arg4[%c0_6, %c0_7] : memref<32x32xf32, #tpu.memory_space<vmem>>, vector<32x32xf32>
    %cst_8 = arith.constant dense<0.000000e+00> : vector<8x32xf32>
    %9 = tpu.matmul %7, %8, %cst_8 {dimension_numbers = #tpu.dot_dimension_numbers<[1], [0], [0], [1], [0, 0, 1, 1], [], []>} : vector<8x32xf32>, vector<32x32xf32>, vector<8x32xf32> -> vector<8x32xf32>
    %c0_9 = arith.constant 0 : index
    %c0_10 = arith.constant 0 : index
    %10 = vector.load %arg5[%c0_9, %c0_10] : memref<1x32xf32, #tpu.memory_space<vmem>>, vector<1x32xf32>
    %11 = vector.broadcast %10 : vector<1x32xf32> to vector<8x32xf32>
    %12 = arith.addf %9, %11 : vector<8x32xf32>
    %cst_11 = arith.constant 0.000000e+00 : f32
    %13 = vector.broadcast %cst_11 : f32 to vector<8x32xf32>
    %14 = arith.maximumf %12, %13 : vector<8x32xf32>
    %c0_12 = arith.constant 0 : index
    %c0_13 = arith.constant 0 : index
    %15 = vector.load %arg6[%c0_12, %c0_13] : memref<32x32xf32, #tpu.memory_space<vmem>>, vector<32x32xf32>
    %cst_14 = arith.constant dense<0.000000e+00> : vector<8x32xf32>
    %16 = tpu.matmul %14, %15, %cst_14 {dimension_numbers = #tpu.dot_dimension_numbers<[1], [0], [0], [1], [0, 0, 1, 1], [], []>} : vector<8x32xf32>, vector<32x32xf32>, vector<8x32xf32> -> vector<8x32xf32>
    %c0_15 = arith.constant 0 : index
    %c0_16 = arith.constant 0 : index
    %17 = vector.load %arg7[%c0_15, %c0_16] : memref<1x32xf32, #tpu.memory_space<vmem>>, vector<1x32xf32>
    %18 = vector.broadcast %17 : vector<1x32xf32> to vector<8x32xf32>
    %19 = arith.addf %16, %18 : vector<8x32xf32>
    %cst_17 = arith.constant 0.000000e+00 : f32
    %20 = vector.broadcast %cst_17 : f32 to vector<8x32xf32>
    %21 = arith.maximumf %19, %20 : vector<8x32xf32>
    %c0_18 = arith.constant 0 : index
    %c0_19 = arith.constant 0 : index
    %22 = vector.load %arg8[%c0_18, %c0_19] : memref<32x4xf32, #tpu.memory_space<vmem>>, vector<32x4xf32>
    %cst_20 = arith.constant dense<0.000000e+00> : vector<8x4xf32>
    %23 = tpu.matmul %21, %22, %cst_20 {dimension_numbers = #tpu.dot_dimension_numbers<[1], [0], [0], [1], [0, 0, 1, 1], [], []>} : vector<8x32xf32>, vector<32x4xf32>, vector<8x4xf32> -> vector<8x4xf32>
    %c0_21 = arith.constant 0 : index
    %c0_22 = arith.constant 0 : index
    %24 = vector.load %arg9[%c0_21, %c0_22] : memref<1x4xf32, #tpu.memory_space<vmem>>, vector<1x4xf32>
    %25 = vector.broadcast %24 : vector<1x4xf32> to vector<8x4xf32>
    %26 = arith.addf %23, %25 : vector<8x4xf32>
    %c0_23 = arith.constant 0 : index
    %c0_24 = arith.constant 0 : index
    %27 = vector.load %arg10[%c0_23, %c0_24] : memref<8x4xf32, #tpu.memory_space<vmem>>, vector<8x4xf32>
    tpu.vector_store %arg10[%c0_23, %c0_24], %26 {strides = array<i32>} : memref<8x4xf32, #tpu.memory_space<vmem>>, vector<8x4xf32>,
    return
  }
  func.func @transform_0(%arg0: i32) -> (i32, i32) {
    %c0_i32 = arith.constant 0 : i32
    %c0_i32_0 = arith.constant 0 : i32
    return %arg0, %c0_i32 : i32, i32
  }
  func.func @transform_1(%arg0: i32) -> (i32, i32) {
    %c0_i32 = arith.constant 0 : i32
    %c0_i32_0 = arith.constant 0 : i32
    %c0_i32_1 = arith.constant 0 : i32
    return %c0_i32, %c0_i32_0 : i32, i32
  }
  func.func @transform_2(%arg0: i32) -> (i32, i32) {
    %c0_i32 = arith.constant 0 : i32
    %c0_i32_0 = arith.constant 0 : i32
    %c0_i32_1 = arith.constant 0 : i32
    return %c0_i32, %c0_i32_0 : i32, i32
  }
  func.func @transform_3(%arg0: i32) -> (i32, i32) {
    %c0_i32 = arith.constant 0 : i32
    %c0_i32_0 = arith.constant 0 : i32
    %c0_i32_1 = arith.constant 0 : i32
    return %c0_i32, %c0_i32_0 : i32, i32
  }
  func.func @transform_4(%arg0: i32) -> (i32, i32) {
    %c0_i32 = arith.constant 0 : i32
    %c0_i32_0 = arith.constant 0 : i32
    %c0_i32_1 = arith.constant 0 : i32
    return %c0_i32, %c0_i32_0 : i32, i32
  }
  func.func @transform_5(%arg0: i32) -> (i32, i32) {
    %c0_i32 = arith.constant 0 : i32
    %c0_i32_0 = arith.constant 0 : i32
    %c0_i32_1 = arith.constant 0 : i32
    return %c0_i32, %c0_i32_0 : i32, i32
  }
  func.func @transform_6(%arg0: i32) -> (i32, i32) {
    %c0_i32 = arith.constant 0 : i32
    %c0_i32_0 = arith.constant 0 : i32
    %c0_i32_1 = arith.constant 0 : i32
    return %c0_i32, %c0_i32_0 : i32, i32
  }
  func.func @transform_7(%arg0: i32) -> (i32, i32) {
    %c0_i32 = arith.constant 0 : i32
    %c0_i32_0 = arith.constant 0 : i32
    %c0_i32_1 = arith.constant 0 : i32
    return %c0_i32, %c0_i32_0 : i32, i32
  }
  func.func @transform_8(%arg0: i32) -> (i32, i32) {
    %c0_i32 = arith.constant 0 : i32
    %c0_i32_0 = arith.constant 0 : i32
    %c0_i32_1 = arith.constant 0 : i32
    return %c0_i32, %c0_i32_0 : i32, i32
  }
  func.func @transform_9(%arg0: i32) -> (i32, i32) {
    %c0_i32 = arith.constant 0 : i32
    %c0_i32_0 = arith.constant 0 : i32
    return %arg0, %c0_i32 : i32, i32
  }
}

</mosaic_0001>

<bundles_post_ra>
// kernel: tpu_custom_call.1
= control target key start
LH: loop header
LB: loop body
LE: loop exit
PB: predicated region body
PF: predicated region fallthrough
CT: control target
= control target key end

     0   :  { %14 = vsyncpa [#allocation3], 0  ;;  %s680_s0 = inlined_call_operand.vmem [shape: f32[8,16], index: 0, kind: input, shape index: {}]   ;;  %s681_s1 = inlined_call_operand.hbm [shape: f32[16,32], index: 1, kind: input, shape index: {}]   ;;  %s682_s2 = inlined_call_operand.vmem [shape: f32[1,32], index: 2, kind: input, shape index: {}]   ;;  %s683_s3 = inlined_call_operand.vmem [shape: f32[32,32], index: 3, kind: input, shape index: {}]   ;;  %s684_s4 = inlined_call_operand.vmem [shape: f32[1,32], index: 4, kind: input, shape index: {}]   ;;  %s685_s5 = inlined_call_operand.hbm [shape: f32[32,32], index: 5, kind: input, shape index: {}]   ;;  %s686_s6 = inlined_call_operand.vmem [shape: f32[1,32], index: 6, kind: input, shape index: {}]   ;;  %s687_s7 = inlined_call_operand.vmem [shape: f32[32,4], index: 7, kind: input, shape index: {}]   ;;  %s688_s8 = inlined_call_operand.vmem [shape: f32[1,4], index: 8, kind: input, shape index: {}]   ;;  %s689_s9 = inlined_call_operand.vmem [shape: f32[8,4], index: 9, kind: output, shape index: {}]  }
   0x1   :  { %15 = vsyncpa [#allocation5], 0  ;;  %s550_s30 = smov [#allocation2]   ;;  %s502_s13 = scalar_lea.hbm %s681_s1, 256 }
   0x2   :  { %s23_s10 = sshll.u32 %s550_s30, 4  ;;  %p503_p0 = scmp.ne.s32.totalorder %s681_s1, %s502_s13  ;;  %s24_s10 = int_to_ptr.vmem [resolvable:$true] %s23_s10 }
   0x3   :  { %p506_p1 = scmp.lt.u32.totalorder %s502_s13, %s681_s1 }
   0x5   :  { %p508_p2 = pnand %p506_p1, %p503_p0 }
   0x7   :  { %511 = shalt.err (!%p508_p2)
}
   0x8   :  { %s512_s18 = scalar_lea.vmem %s24_s10, 256  ;;  %p517_p4 = scmp.lt.s32.totalorder %s24_s10, %s24_s10 }
   0x9   :  { %p513_p3 = scmp.ne.s32.totalorder %s24_s10, %s512_s18  ;;  %p518_p5 = scmp.lt.s32.totalorder %s512_s18, %s512_s18 }
   0xb   :  { %p519_p6 = por %p518_p5, %p517_p4 }
   0xd   :  { %p520_p7 = pnand %p519_p6, %p513_p3 }
   0xf   :  { %523 = shalt.err (!%p520_p7)
}
  0x10   :  { %s551_s19 = smov 128   ;;  %s552_s20 = smov 8  }
  0x11   :  { %29 = dma.hbm_to_vmem [thread:$0]  %s681_s1, 256, %s24_s10, [#allocation3], %s551_s19, %s551_s19, %s552_s20  }
  0x12   :  { %s553_s23 = smov [#allocation4]   ;;  %s524_s27 = scalar_lea.hbm %s685_s5, 512 }
  0x13   :  { %s41_s24 = sshll.u32 %s553_s23, 4  ;;  %p525_p8 = scmp.ne.s32.totalorder %s685_s5, %s524_s27  ;;  %s42_s24 = int_to_ptr.vmem [resolvable:$true] %s41_s24 }
  0x14   :  { %p528_p9 = scmp.lt.u32.totalorder %s524_s27, %s685_s5 }
  0x16   :  { %p530_p10 = pnand %p528_p9, %p525_p8 }
  0x18   :  { %533 = shalt.err (!%p530_p10)
}
  0x19   :  { %s534_s12 = scalar_lea.vmem %s42_s24, 512  ;;  %p539_p12 = scmp.lt.s32.totalorder %s42_s24, %s42_s24 }
  0x1a   :  { %p535_p11 = scmp.ne.s32.totalorder %s42_s24, %s534_s12  ;;  %p540_p13 = scmp.lt.s32.totalorder %s534_s12, %s534_s12 }
  0x1c   :  { %p541_p0 = por %p540_p13, %p539_p12 }
  0x1e   :  { %p542_p1 = pnand %p541_p0, %p535_p11 }
  0x20   :  { %545 = shalt.err (!%p542_p1)
}
  0x21   :  { %47 = dma.hbm_to_vmem [thread:$0]  %s685_s5, 512, %s42_s24, [#allocation5], %s551_s19, %s551_s19, %s552_s20  }
  0x22   :  { %546 = dma.done.wait [#allocation3], 256  }
  0x23   :  { %547 = vsyncadd [#allocation3], 4294967040 }
  0x24   :  { %548 = dma.done.wait [#allocation5], 512  }
  0x25   :  { %549 = vsyncadd [#allocation5], 4294966784  ;;  %v554_v0 = vmov 0.0|0.0   ;;  %vm555_vm0 = vmmov 0   ;;  %v556_v1 = vmov 0.0   ;;  %v61_v2 = vld [vmem:[#allocation2] sm:$0xff] }
  0x26   :  { %474 = vmatprep.subr.bf16.mxu0 %v554_v0  ;;  %438 = vmatprep.mubr.msk.f32.mxu0 %vm555_vm0, %v556_v1  ;;  %v62_v3 = vld [vmem:[#allocation2 + $0x8] sm:$0xff]  ;;  %v145_v5 = vld [vmem:[%s683_s3] sm:$0xff]  ;;  %vm70_vm1 = vcmask 130048   ;;  %v147_v9 = vld [vmem:[%s683_s3 + $0x10] sm:$0xff]  ;;  %vm156_vm2 = vcmask 261120   ;;  %vm400_vm3 = vcmask 31744  }
  0x27   :  { %477 = vmatprep.subr.bf16.mxu1 %v554_v0  ;;  %449 = vmatprep.mubr.msk.f32.mxu1 %vm555_vm0, %v556_v1  ;;  %v475_v4 = vpack.c.bf16 %v62_v3, %v61_v2  ;;  %v146_v6 = vld [vmem:[%s683_s3 + $0x8] sm:$0xff]  ;;  %v60_v8 = vld [vmem:[%s680_s0] sm:$0xff]  ;;  %v148_v10 = vld [vmem:[%s683_s3 + $0x18] sm:$0xff] }
  0x28   :  { %v478_v7 = vpack.c.bf16 %v146_v6, %v145_v5  ;;  %v481_v11 = vpack.c.bf16 %v148_v10, %v147_v9  ;;  %v231_v12 = vld [vmem:[#allocation4] sm:$0xff]  ;;  %v232_v13 = vld [vmem:[#allocation4 + $0x8] sm:$0xff]  ;;  %v408_v15 = vld [vmem:[%s682_s2] ss:$0 sm:$0xff] }
  0x29   :  { %476 = vmatpush3.bf16.msra.mxu0 %v475_v4  ;;  %v484_v14 = vpack.c.bf16 %v232_v13, %v231_v12  ;;  %v233_v20 = vld [vmem:[#allocation4 + $0x10] sm:$0xff]  ;;  %v234_v21 = vld [vmem:[#allocation4 + $0x18] sm:$0xff]  ;;  %v318_v31 = vld [vmem:[%s687_s7 + $0x10] sm:$0xff] }
  0x2a   :  { %479 = vmatpush3.bf16.msra.mxu1 %v478_v7  ;;  %483 = vmatprep.subr.bf16.mxu0 %v554_v0  ;;  %v487_v22 = vpack.c.bf16 %v234_v21, %v233_v20  ;;  %v316_v23 = vld [vmem:[%s687_s7] sm:$0xff]  ;;  %v317_v24 = vld [vmem:[%s687_s7 + $0x8] sm:$0xff]  ;;  %v319_v32 = vld [vmem:[%s687_s7 + $0x18] sm:$0xff] }
  0x2b   :  { %480 = vmatprep.subr.bf16.mxu1 %v554_v0  ;;  %v490_v25 = vpack.c.bf16 %v317_v24, %v316_v23  ;;  %v410_v26 = vld [vmem:[%s684_s4] ss:$0 sm:$0xff]  ;;  %v493_v33 = vpack.c.bf16 %v319_v32, %v318_v31 }
  0x2c   :  { %439 = vmatmul.mubr.msk.f32.vlgmr.msra.gmra.mrb[0].mxu0 %vm70_vm1, %v60_v8  ;;  %v412_v34 = vld [vmem:[%s686_s6] ss:$0 sm:$0xff] }
  0x2d   :  { %460 = vmatprep.mubr.msk.f32.mxu0 %vm555_vm0, %v556_v1  ;;  %485 = vmatpush3.bf16.msra.mxu0 %v484_v14  ;;  %v414_v39 = vld [vmem:[%s688_s8] ss:$0 sm:$0xff] }
  0x2e   :  { %482 = vmatpush3.bf16.msra.mxu1 %v481_v11  ;;  %486 = vmatprep.subr.bf16.mxu0 %v554_v0 }
  0x2f   :  { %489 = vmatprep.subr.bf16.mxu1 %v554_v0 }
  0x31   :  { %488 = vmatpush3.bf16.msra.mxu0 %v487_v22 }
  0xff   :  { %v140_v16 = vpop.f32.mrb[0].mxu0 }
 0x100   :  { %v141_v17 = vadd.f32 %v408_v15, %v140_v16  ;;  %v440_v18 = vpop.f32.mrb[1].mxu0 }
 0x102   :  { %v144_v19 = vmax.f32 %v141_v17, 0.0 }
 0x104   :  { %450 = vmatmul.mubr.msk.f32.vlgmr.msra.gmra.mrb[0].mxu1 %vm156_vm2, %v144_v19 }
 0x105   :  { %471 = vmatprep.mubr.msk.f32.mxu1 %vm555_vm0, %v556_v1  ;;  %491 = vmatpush3.bf16.msra.mxu1 %v490_v25 }
 0x106   :  { %492 = vmatprep.subr.bf16.mxu1 %v554_v0 }
 0x109   :  { %494 = vmatpush3.bf16.msra.mxu1 %v493_v33 }
 0x1d7   :  { %v226_v27 = vpop.f32.mrb[0].mxu1 }
 0x1d8   :  { %v227_v28 = vadd.f32 %v410_v26, %v226_v27  ;;  %v451_v29 = vpop.f32.mrb[1].mxu1 }
 0x1da   :  { %v230_v30 = vmax.f32 %v227_v28, 0.0 }
 0x1dc   :  { %461 = vmatmul.mubr.msk.f32.vlgmr.msra.gmra.mrb[2].mxu0 %vm156_vm2, %v230_v30 }
 0x2af   :  { %v311_v35 = vpop.f32.mrb[2].mxu0 }
 0x2b0   :  { %v312_v36 = vadd.f32 %v412_v34, %v311_v35  ;;  %v462_v37 = vpop.f32.mrb[3].mxu0 }
 0x2b2   :  { %v315_v38 = vmax.f32 %v312_v36, 0.0 }
 0x2b4   :  { %472 = vmatmul.mubr.msk.f32.vlgmr.msra.gmra.mrb[2].mxu1 %vm156_vm2, %v315_v38 }
 0x387   :  { %v396_v40 = vpop.f32.mrb[2].mxu1 }
 0x388   :  { %v397_v41 = vadd.f32 %v414_v39, %v396_v40  ;;  %v473_v42 = vpop.f32.mrb[3].mxu1 }
 0x38a   :  { %401 = vst.msk [vmem:[%s689_s9] sm:$0xff] %vm400_vm3, %v397_v41 }
 0x38b   :  { %406 = vsyncpa [#allocation3], 1 }
 0x38c   :  { %407 = vsyncpa [#allocation5], 1 }

</bundles_post_ra>
